<compile_context>
chip_gen: v7x
topology: tpu7x:2x2x1
jax: 0.10.0
libtpu: 0.0.40
codegen_flags: <defaults>
</compile_context>

<pallas_src>
import jax
import jax.numpy as jnp
from jax.experimental import pallas as pl
from jax.experimental.pallas import tpu as pltpu


def _round_up(x, m):
    return ((x + m - 1) // m) * m


def _cdiv(a, b):
    return (a + b - 1) // b


def _vmem_capacity_bytes():
    """Per-TensorCore VMEM capacity; conservative 64 MiB fallback (v7x)."""
    try:
        return int(pltpu.get_tpu_info().vmem_capacity_bytes)
    except Exception:
        return 64 * 1024 * 1024


# ---------------------------------------------------------------------------
# Kernels
# ---------------------------------------------------------------------------
def _linear_resident_kernel(x_ref, w_ref, b_ref, o_ref):
    # x_ref: (tm, K) streamed over M;  w_ref: (K, N) resident (DMA'd once);
    # b_ref: (1, N) resident;          o_ref: (tm, N) f32 output tile.
    o_ref[...] = (
        jnp.dot(x_ref[...], w_ref[...], preferred_element_type=jnp.float32)
        + b_ref[...]
    ).astype(o_ref.dtype)


def _linear_tiled_kernel(x_ref, w_ref, b_ref, o_ref):
    # x_ref: (tm, tk); w_ref: (tk, tn); b_ref: (1, tn); o_ref: (tm, tn) f32.
    # Output block is resident across k -> accumulate directly into o_ref.
    k = pl.program_id(2)

    @pl.when(k == 0)
    def _():
        o_ref[...] = jnp.zeros_like(o_ref)

    o_ref[...] += jnp.dot(x_ref[...], w_ref[...],
                          preferred_element_type=jnp.float32)

    @pl.when(k == pl.num_programs(2) - 1)
    def _():
        o_ref[...] += b_ref[...]


# ---------------------------------------------------------------------------
# Wrappers
# ---------------------------------------------------------------------------
def prepare_params(weight, bias, *, compute_dtype=jnp.bfloat16):
    """One-time conversion of PyTorch nn.Linear params to kernel layout.

    weight: (N, K) PyTorch (out_features, in_features) layout.
    Returns weight_kn with shape (K, N) in `compute_dtype`, bias float32.
    Done once at parameter time, not per forward call.
    """
    weight_kn = jnp.asarray(weight, compute_dtype).T
    return weight_kn, jnp.asarray(bias, jnp.float32)


def _linear_resident(x2, w, b, M, K, N, vmem_cap):
    itemsize = jnp.dtype(x2.dtype).itemsize
    if M <= 512:
        tm = M
    else:
        tm = _round_up(_cdiv(M, _cdiv(M, 512)), 8)
    Mp = _round_up(M, tm)
    x_p = x2 if Mp == M else jnp.pad(x2, ((0, Mp - M), (0, 0)))

    working = (2 * tm * K * itemsize      # double-buffered x
               + K * N * itemsize         # resident weight (fetched once)
               + N * 4                    # resident bias
               + 2 * tm * N * 4)          # double-buffered output
    vmem_limit = int(min(0.8 * vmem_cap, max(2 * working, 32 << 20)))

    out = pl.pallas_call(
        _linear_resident_kernel,
        out_shape=jax.ShapeDtypeStruct((Mp, N), jnp.float32),
        grid_spec=pltpu.PrefetchScalarGridSpec(
            num_scalar_prefetch=0,
            grid=(Mp // tm,),
            in_specs=[
                pl.BlockSpec((tm, K), lambda i: (i, 0)),   # x streams over M
                pl.BlockSpec((K, N), lambda i: (0, 0)),    # weight resident
                pl.BlockSpec((1, N), lambda i: (0, 0)),    # bias resident
            ],
            out_specs=pl.BlockSpec((tm, N), lambda i: (i, 0)),
        ),
        compiler_params=pltpu.CompilerParams(
            dimension_semantics=("parallel",),
            vmem_limit_bytes=vmem_limit,
        ),
        cost_estimate=pl.CostEstimate(
            flops=2 * M * N * K,
            transcendentals=0,
            bytes_accessed=itemsize * (M * K + K * N) + 4 * (M * N + N),
        ),
    )(x_p, w, b)
    if Mp != M:
        out = out[:M]
    return out


def _linear_tiled(x2, w, b, M, K, N, tm, tn, tk, vmem_cap):
    itemsize = jnp.dtype(x2.dtype).itemsize

    # Derive tiles that divide the (minimally padded) problem.
    tm = _round_up(_cdiv(M, _cdiv(M, tm)), 8)
    tn = _round_up(_cdiv(N, _cdiv(N, tn)), 128)
    tk = _round_up(_cdiv(K, _cdiv(K, tk)), 128)

    def working_set(tm_, tn_, tk_):
        return (2 * tm_ * tk_ * itemsize + 2 * tk_ * tn_ * itemsize
                + tm_ * tn_ * 4 + 2 * tn_ * 4)

    # Shrink until the buffered working set fits this generation's VMEM
    # (v7x has only 64 MiB per TensorCore).
    budget = int(0.4 * vmem_cap)
    while working_set(tm, tn, tk) > budget and tk > 128:
        tk = max(128, tk // 2)
    while working_set(tm, tn, tk) > budget and tn > 128:
        tn = max(128, tn // 2)
    while working_set(tm, tn, tk) > budget and tm > 8:
        tm = max(8, tm // 2)

    Mp, Np, Kp = _round_up(M, tm), _round_up(N, tn), _round_up(K, tk)
    x_p = x2 if (Mp == M and Kp == K) else jnp.pad(x2, ((0, Mp - M), (0, Kp - K)))
    w_p = w if (Kp == K and Np == N) else jnp.pad(w, ((0, Kp - K), (0, Np - N)))
    b_p = b if Np == N else jnp.pad(b, ((0, 0), (0, Np - N)))

    grid = (Mp // tm, Np // tn, Kp // tk)
    vmem_limit = int(min(0.8 * vmem_cap,
                         max(2 * working_set(tm, tn, tk), 32 << 20)))

    out = pl.pallas_call(
        _linear_tiled_kernel,
        out_shape=jax.ShapeDtypeStruct((Mp, Np), jnp.float32),
        grid_spec=pltpu.PrefetchScalarGridSpec(
            num_scalar_prefetch=0,
            grid=grid,
            in_specs=[
                pl.BlockSpec((tm, tk), lambda i, j, k: (i, k)),  # x
                pl.BlockSpec((tk, tn), lambda i, j, k: (k, j)),  # weight (K,N)
                pl.BlockSpec((1, tn), lambda i, j, k: (0, j)),   # bias
            ],
            out_specs=pl.BlockSpec((tm, tn), lambda i, j, k: (i, j)),
        ),
        compiler_params=pltpu.CompilerParams(
            dimension_semantics=("parallel", "parallel", "arbitrary"),
            vmem_limit_bytes=vmem_limit,
        ),
        cost_estimate=pl.CostEstimate(
            flops=2 * M * N * K,
            transcendentals=0,
            bytes_accessed=(itemsize * (M * K * _cdiv(N, tn)
                                        + K * N * _cdiv(M, tm))
                            + 4 * (M * N + N)),
        ),
    )(x_p, w_p, b_p)
    if Mp != M or Np != N:
        out = out[:M, :N]
    return out


def linear_forward(x, weight_kn, bias, *, compute_dtype=jnp.bfloat16,
                   tm=512, tn=512, tk=1024,
                   weight_residency_bytes=16 * 1024 * 1024):
    """y = x @ weight_kn + bias  (== nn.Linear forward with pre-transposed W).

    x:         (..., K)
    weight_kn: (K, N)  -- from prepare_params()
    bias:      (N,) float32
    returns    (..., N) float32
    """
    K = x.shape[-1]
    Kw, N = weight_kn.shape
    assert K == Kw, "input_dim mismatch"

    x2 = x.reshape(-1, K).astype(compute_dtype)
    w = weight_kn.astype(compute_dtype)
    b = jnp.asarray(bias, jnp.float32).reshape(1, N)
    M = x2.shape[0]

    itemsize = jnp.dtype(compute_dtype).itemsize
    vmem_cap = _vmem_capacity_bytes()

    if K * N * itemsize <= min(weight_residency_bytes, vmem_cap // 4):
        out = _linear_resident(x2, w, b, M, K, N, vmem_cap)
    else:
        out = _linear_tiled(x2, w, b, M, K, N, tm, tn, tk, vmem_cap)

    return out.reshape(x.shape[:-1] + (N,))


def init_linear_params(key, input_dim, output_dim):
    """PyTorch nn.Linear default init: U(-1/sqrt(K), 1/sqrt(K)), (N, K) layout."""
    kw, kb = jax.random.split(key)
    bound = 1.0 / jnp.sqrt(jnp.float32(input_dim))
    weight = jax.random.uniform(
        kw, (output_dim, input_dim), dtype=jnp.float32, minval=-bound, maxval=bound
    )
    bias = jax.random.uniform(
        kb, (output_dim,), dtype=jnp.float32, minval=-bound, maxval=bound
    )
    return weight, bias


if __name__ == "__main__":
    key = jax.random.PRNGKey(0)
    k_x, k_p, k_x2, k_p2 = jax.random.split(key, 4)

    # --- small case (weight-resident fast path) ---
    batch, input_dim, output_dim = 8, 32, 16
    x = jax.random.normal(k_x, (batch, input_dim), dtype=jnp.float32)
    weight, bias = init_linear_params(k_p, input_dim, output_dim)
    weight_kn, bias_f32 = prepare_params(weight, bias, compute_dtype=jnp.bfloat16)

    y = linear_forward(x, weight_kn, bias_f32)
    y = jax.block_until_ready(y)

    y_ref = x @ weight.T + bias
    assert y.shape == (batch, output_dim)
    # bf16 operands + f32 accumulation -> loosened tolerance vs f32 reference.
    assert jnp.allclose(y, y_ref, atol=3e-2, rtol=3e-2), float(
        jnp.max(jnp.abs(y - y_ref)))

    # --- exercise the general 3-D tiled path as well (forced) ---
    M2, K2, N2 = 260, 200, 130
    x2 = jax.random.normal(k_x2, (M2, K2), dtype=jnp.float32)
    w2, b2 = init_linear_params(k_p2, K2, N2)
    w2_kn, b2_f32 = prepare_params(w2, b2, compute_dtype=jnp.bfloat16)
    y2 = linear_forward(x2, w2_kn, b2_f32, weight_residency_bytes=0)
    y2 = jax.block_until_ready(y2)
    y2_ref = x2 @ w2.T + b2
    assert y2.shape == (M2, N2)
    assert jnp.allclose(y2, y2_ref, atol=6e-2, rtol=6e-2), float(
        jnp.max(jnp.abs(y2 - y2_ref)))

    print("KERNEL_OK")
</pallas_src>

<mosaic_0001>
module attributes {stable_mosaic.version = 11 : i64} {
  func.func @_linear_resident_kernel(%arg0: i32, %arg1: memref<8x32xbf16, #tpu.memory_space<vmem>>, %arg2: memref<32x16xbf16, #tpu.memory_space<vmem>>, %arg3: memref<1x16xf32, #tpu.memory_space<vmem>>, %arg4: memref<8x16xf32, #tpu.memory_space<vmem>>) attributes {dimension_semantics = [#tpu.dimension_semantics<parallel>], iteration_bounds = array<i64: 1>, scalar_prefetch = 0 : i64, scratch_operands = 0 : i64, tpu.core_type = #tpu.core_type<tc>, window_params = [{transform_indices = @transform_0, window_bounds = array<i64: 8, 32>}, {pipeline_mode = #tpu.pipeline_mode<synchronous>, transform_indices = @transform_1, window_bounds = array<i64: 32, 16>}, {pipeline_mode = #tpu.pipeline_mode<synchronous>, transform_indices = @transform_2, window_bounds = array<i64: 1, 16>}, {transform_indices = @transform_3, window_bounds = array<i64: 8, 16>}]} {
    %c0 = arith.constant 0 : index
    %c0_0 = arith.constant 0 : index
    %0 = vector.load %arg1[%c0, %c0_0] : memref<8x32xbf16, #tpu.memory_space<vmem>>, vector<8x32xbf16>
    %c0_1 = arith.constant 0 : index
    %c0_2 = arith.constant 0 : index
    %1 = vector.load %arg2[%c0_1, %c0_2] : memref<32x16xbf16, #tpu.memory_space<vmem>>, vector<32x16xbf16>
    %cst = arith.constant dense<0.000000e+00> : vector<8x16xf32>
    %2 = tpu.matmul %0, %1, %cst {dimension_numbers = #tpu.dot_dimension_numbers<[1], [0], [0], [1], [0, 0, 1, 1], [], []>} : vector<8x32xbf16>, vector<32x16xbf16>, vector<8x16xf32> -> vector<8x16xf32>
    %c0_3 = arith.constant 0 : index
    %c0_4 = arith.constant 0 : index
    %3 = vector.load %arg3[%c0_3, %c0_4] : memref<1x16xf32, #tpu.memory_space<vmem>>, vector<1x16xf32>
    %4 = vector.broadcast %3 : vector<1x16xf32> to vector<8x16xf32>
    %5 = arith.addf %2, %4 : vector<8x16xf32>
    %c0_5 = arith.constant 0 : index
    %c0_6 = arith.constant 0 : index
    %6 = vector.load %arg4[%c0_5, %c0_6] : memref<8x16xf32, #tpu.memory_space<vmem>>, vector<8x16xf32>
    tpu.vector_store %arg4[%c0_5, %c0_6], %5 {strides = array<i32>} : memref<8x16xf32, #tpu.memory_space<vmem>>, vector<8x16xf32>,
    return
  }
  func.func @transform_0(%arg0: i32) -> (i32, i32) {
    %c0_i32 = arith.constant 0 : i32
    %c0_i32_0 = arith.constant 0 : i32
    return %arg0, %c0_i32 : i32, i32
  }
  func.func @transform_1(%arg0: i32) -> (i32, i32) {
    %c0_i32 = arith.constant 0 : i32
    %c0_i32_0 = arith.constant 0 : i32
    %c0_i32_1 = arith.constant 0 : i32
    return %c0_i32, %c0_i32_0 : i32, i32
  }
  func.func @transform_2(%arg0: i32) -> (i32, i32) {
    %c0_i32 = arith.constant 0 : i32
    %c0_i32_0 = arith.constant 0 : i32
    %c0_i32_1 = arith.constant 0 : i32
    return %c0_i32, %c0_i32_0 : i32, i32
  }
  func.func @transform_3(%arg0: i32) -> (i32, i32) {
    %c0_i32 = arith.constant 0 : i32
    %c0_i32_0 = arith.constant 0 : i32
    return %arg0, %c0_i32 : i32, i32
  }
}

</mosaic_0001>

<bundles_post_ra>
// kernel: tpu_custom_call.1
= control target key start
LH: loop header
LB: loop body
LE: loop exit
PB: predicated region body
PF: predicated region fallthrough
CT: control target
= control target key end

     0   :  { %v144_v1 = vmov 0.0   ;;  %vm145_vm0 = vmmov 0   ;;  %s191_s0 = inlined_call_operand.vmem [shape: bf16[8,32], index: 0, kind: input, shape index: {}]   ;;  %s192_s1 = inlined_call_operand.vmem [shape: bf16[32,16], index: 1, kind: input, shape index: {}]   ;;  %s193_s2 = inlined_call_operand.vmem [shape: f32[1,16], index: 2, kind: input, shape index: {}]   ;;  %s194_s3 = inlined_call_operand.hbm [shape: f32[8,16], index: 3, kind: output, shape index: {}]  }
   0x1   :  { %v118_v0 = vld [vmem:[%s192_s1] sm:$0xff]   ;;  %107 = vmatprep.subr.bf16.mxu0 %v144_v1  ;;  %v119_v2 = vld [vmem:[%s192_s1 + $0x8] sm:$0xff]   ;;  %111 = vmatprep.mubr.msk.bf16.mxu0 %vm145_vm0, %v144_v1 }
   0x2   :  { %108 = vmatpush3.bf16.msra.mxu0 %v118_v0 }
   0x3   :  { %109 = vmatprep.subr.bf16.mxu0 %v144_v1 }
   0x4   :  { %8 = vsyncpa [#allocation3], 0  ;;  %v16_v3 = vld [vmem:[%s191_s0] sm:$0xf]  ;;  %vm40_vm1 = vcmask 261120   ;;  %s146_s20 = smov [#allocation2]  }
   0x5   :  { %v100_v4 = vld [vmem:[%s193_s2] ss:$0 sm:$0xff]  ;;  %s92_s21 = sshll.u32 %s146_s20, 4  ;;  %vm84_vm2 = vcmask 130048   ;;  %s93_s21 = int_to_ptr.vmem [resolvable:$true] %s92_s21 }
   0x6   :  { %110 = vmatpush3.bf16.msra.mxu0 %v119_v2  ;;  %s120_s1 = scalar_lea.vmem %s93_s21, 128  ;;  %p125_p1 = scmp.lt.s32.totalorder %s93_s21, %s93_s21 }
   0x7   :  { %p121_p0 = scmp.ne.s32.totalorder %s93_s21, %s120_s1  ;;  %p126_p2 = scmp.lt.s32.totalorder %s120_s1, %s120_s1 }
   0x9   :  { %112 = vmatmul.mubr.msk.bf16.vlgmr.msra.gmra.mrb[0].mxu0 %vm40_vm1, %v16_v3  ;;  %p127_p3 = por %p126_p2, %p125_p1 }
   0xb   :  { %p128_p4 = pnand %p127_p3, %p121_p0 }
  0xdc   :  { %v78_v5 = vpop.f32.mrb[0].mxu0 }
  0xdd   :  { %v79_v6 = vadd.f32 %v100_v4, %v78_v5  ;;  %v113_v7 = vpop.f32.mrb[1].mxu0 }
  0xde   :  { %v81_v8 = vpop.f32.mrb[2].mxu0 }
  0xdf   :  { %v114_v9 = vpop.f32.mrb[3].mxu0  ;;  %85 = vst.msk [vmem:[#allocation2] sm:$0xff] %vm84_vm2, %v79_v6 }
  0xe0   :  { %131 = shalt.err (!%p128_p4)
}
  0xe1   :  { %s132_s2 = scalar_lea.hbm %s194_s3, 128 }
  0xe2   :  { %p133_p5 = scmp.ne.s32.totalorder %s194_s3, %s132_s2  ;;  %p136_p6 = scmp.lt.u32.totalorder %s132_s2, %s194_s3 }
  0xe4   :  { %p138_p7 = pnand %p136_p6, %p133_p5 }
  0xe6   :  { %141 = shalt.err (!%p138_p7)
}
  0xe7   :  { %95 = dma.vmem_to_hbm [thread:$0]  %s93_s21, 128, %s194_s3, [#allocation3]  }
  0xe8   :  { %142 = dma.done.wait [#allocation3], 128  }
  0xe9   :  { %143 = vsyncadd [#allocation3], 4294967168 }
  0xea   :  { %99 = vsyncpa [#allocation3], 1 }

</bundles_post_ra>
